<compile_context>
chip_gen: v7x
topology: tpu7x:2x2x1
jax: 0.10.0
libtpu: 0.0.40
codegen_flags: <defaults>
</compile_context>

<pallas_src>
import jax
import jax.numpy as jnp
from jax.experimental import pallas as pl
from jax.experimental.pallas import tpu as pltpu


def _max_identity(dtype):
    """Identity element for a max-reduction in `dtype`."""
    if jnp.issubdtype(dtype, jnp.floating):
        return float("-inf")
    return int(jnp.iinfo(dtype).min)


def _min_sublane(itemsize):
    """Minimum second-to-last block dim for the dtype's packing."""
    return {4: 8, 2: 16, 1: 32}.get(itemsize, 8)


def _pick_batch_tile(B):
    """Prefer a multiple-of-8 divisor of B (parallel axis); else the full batch."""
    for cand in (128, 64, 32, 16, 8):
        if cand < B and B % cand == 0:
            return cand
    return B


def _make_kernel(S, seq_tile, identity, ragged):
    def kernel(x_ref, o_ref):
        # x_ref: (tB, seq_tile, H) input slab
        # o_ref: (tB, H) running-max accumulator, resident across the S axis
        s = pl.program_id(1)

        @pl.when(s == 0)
        def _init():
            o_ref[...] = jnp.full(o_ref.shape, identity, o_ref.dtype)

        x = x_ref[...]
        if ragged:
            # Last S-block may extend past S; fill out-of-range rows with the
            # max identity so they cannot affect the result.
            rows_left = S - s * seq_tile
            row_idx = jax.lax.broadcasted_iota(jnp.int32, x.shape, 1)
            x = jnp.where(row_idx < rows_left, x, jnp.asarray(identity, x.dtype))

        o_ref[...] = jnp.maximum(o_ref[...], jnp.max(x, axis=1))

    return kernel


def masked_global_max_pool_1d(x, *, seq_tile=None, batch_tile=None,
                              vmem_budget_bytes=8 << 20):
    """Pallas equivalent of MaskedGlobalMaxPool1d.forward: max over dim=1.

    x: (B, S, H) -> (B, H)
    """
    B, S, H = x.shape
    dtype = x.dtype
    itemsize = jnp.dtype(dtype).itemsize
    sublane = _min_sublane(itemsize)
    identity = _max_identity(dtype)

    # --- batch tile (leading "parallel" grid axis) -------------------------
    if batch_tile is None:
        batch_tile = _pick_batch_tile(B)
    # Output block is (batch_tile, H): its sublane dim must be a multiple of 8
    # or the full batch, and it must divide B. Fall back to full B otherwise.
    if batch_tile != B and (B % batch_tile != 0 or batch_tile % 8 != 0):
        batch_tile = B

    # --- sequence tile (reduction axis, sized against a per-buffer budget) --
    if seq_tile is None:
        rows = vmem_budget_bytes // max(batch_tile * H * itemsize, 1)
        if rows >= S:
            seq_tile = S
        else:
            seq_tile = max((rows // sublane) * sublane, sublane)
    else:
        if seq_tile < S:
            # Round user-provided tile up to the dtype's sublane requirement.
            seq_tile = max(((seq_tile + sublane - 1) // sublane) * sublane,
                           sublane)
        if seq_tile >= S:
            seq_tile = S
    ragged = (S % seq_tile) != 0

    grid = (B // batch_tile, pl.cdiv(S, seq_tile))

    # --- VMEM limit: double-buffered input + output accumulator + slack -----
    in_block_bytes = batch_tile * seq_tile * H * itemsize
    out_block_bytes = batch_tile * H * itemsize
    vmem_limit = 2 * in_block_bytes + 2 * out_block_bytes + (4 << 20)
    vmem_limit = int(min(max(vmem_limit, 16 << 20), 48 << 20))

    cost = pl.CostEstimate(
        flops=B * S * H,                                    # one max-compare per element
        transcendentals=0,
        bytes_accessed=(B * S * H + B * H) * itemsize,
    )

    return pl.pallas_call(
        _make_kernel(S, seq_tile, identity, ragged),
        out_shape=jax.ShapeDtypeStruct((B, H), dtype),
        grid_spec=pltpu.PrefetchScalarGridSpec(
            num_scalar_prefetch=0,
            grid=grid,
            in_specs=[
                # Full, lane-dense H; VMEM-budgeted slab of S; one batch tile.
                pl.BlockSpec((batch_tile, seq_tile, H),
                             lambda b, s: (b, s, 0)),
            ],
            # Same output block for every S step -> running-max accumulator.
            out_specs=pl.BlockSpec((batch_tile, H), lambda b, s: (b, 0)),
        ),
        compiler_params=pltpu.CompilerParams(
            dimension_semantics=("parallel", "arbitrary"),
            vmem_limit_bytes=vmem_limit,
        ),
        cost_estimate=cost,
    )(x)


if __name__ == "__main__":
    # Case 1: small f32 input matching the module's expected layout (B, S, H).
    B, S, H = 2, 16, 128
    x = jax.random.normal(jax.random.PRNGKey(0), (B, S, H), dtype=jnp.float32)
    y = jax.block_until_ready(masked_global_max_pool_1d(x))
    assert y.shape == (B, H)
    assert jnp.allclose(y, jnp.max(x, axis=1)), "f32 case mismatch"

    # Case 2: ragged S with an explicit small seq_tile -> exercises the cdiv
    # grid and the in-kernel -inf masking of the partial last block.
    x2 = jax.random.normal(jax.random.PRNGKey(0), (2, 37, 128), dtype=jnp.float32)
    y2 = jax.block_until_ready(masked_global_max_pool_1d(x2, seq_tile=8))
    assert jnp.allclose(y2, jnp.max(x2, axis=1)), "ragged case mismatch"

    # Case 3: bf16 input -> auto tile respects the 16-row sublane minimum.
    x3 = jax.random.normal(jax.random.PRNGKey(1), (2, 32, 128),
                           dtype=jnp.float32).astype(jnp.bfloat16)
    y3 = jax.block_until_ready(masked_global_max_pool_1d(x3))
    assert jnp.array_equal(y3, jnp.max(x3, axis=1)), "bf16 case mismatch"

    print("KERNEL_OK")
</pallas_src>

<mosaic_0001>
module attributes {stable_mosaic.version = 11 : i64} {
  func.func @kernel(%arg0: i32, %arg1: i32, %arg2: memref<2x16x128xf32, #tpu.memory_space<vmem>>, %arg3: memref<2x128xf32, #tpu.memory_space<vmem>>) attributes {dimension_semantics = [#tpu.dimension_semantics<parallel>, #tpu.dimension_semantics<arbitrary>], iteration_bounds = array<i64: 1, 1>, scalar_prefetch = 0 : i64, scratch_operands = 0 : i64, tpu.core_type = #tpu.core_type<tc>, window_params = [{transform_indices = @transform_0, window_bounds = array<i64: 2, 16, 128>}, {transform_indices = @transform_1, window_bounds = array<i64: 2, 128>}]} {
    %c0_i32 = arith.constant 0 : i32
    %0 = arith.cmpi eq, %arg1, %c0_i32 : i32
    %1 = arith.extui %0 : i1 to i32
    %c0_i32_0 = arith.constant 0 : i32
    %2 = arith.cmpi ne, %1, %c0_i32_0 : i32
    scf.if %2 {
      %cst_7 = arith.constant 0xFF800000 : f32
      %8 = vector.broadcast %cst_7 : f32 to vector<2x128xf32>
      %c0_8 = arith.constant 0 : index
      %c0_9 = arith.constant 0 : index
      %9 = vector.load %arg3[%c0_8, %c0_9] : memref<2x128xf32, #tpu.memory_space<vmem>>, vector<2x128xf32>
      tpu.vector_store %arg3[%c0_8, %c0_9], %8 {strides = array<i32>} : memref<2x128xf32, #tpu.memory_space<vmem>>, vector<2x128xf32>,
    } else {
    }
    %c0 = arith.constant 0 : index
    %c0_1 = arith.constant 0 : index
    %c0_2 = arith.constant 0 : index
    %3 = vector.load %arg2[%c0, %c0_1, %c0_2] : memref<2x16x128xf32, #tpu.memory_space<vmem>>, vector<2x16x128xf32>
    %c0_3 = arith.constant 0 : index
    %c0_4 = arith.constant 0 : index
    %4 = vector.load %arg3[%c0_3, %c0_4] : memref<2x128xf32, #tpu.memory_space<vmem>>, vector<2x128xf32>
    %cst = arith.constant dense<0xFF800000> : vector<2x128xf32>
    %5 = vector.multi_reduction <maximumf>, %3, %cst [1] : vector<2x16x128xf32> to vector<2x128xf32>
    %6 = arith.maximumf %4, %5 : vector<2x128xf32>
    %c0_5 = arith.constant 0 : index
    %c0_6 = arith.constant 0 : index
    %7 = vector.load %arg3[%c0_5, %c0_6] : memref<2x128xf32, #tpu.memory_space<vmem>>, vector<2x128xf32>
    tpu.vector_store %arg3[%c0_5, %c0_6], %6 {strides = array<i32>} : memref<2x128xf32, #tpu.memory_space<vmem>>, vector<2x128xf32>,
    return
  }
  func.func @transform_0(%arg0: i32, %arg1: i32) -> (i32, i32, i32) {
    %c0_i32 = arith.constant 0 : i32
    %c0_i32_0 = arith.constant 0 : i32
    return %arg0, %arg1, %c0_i32 : i32, i32, i32
  }
  func.func @transform_1(%arg0: i32, %arg1: i32) -> (i32, i32) {
    %c0_i32 = arith.constant 0 : i32
    %c0_i32_0 = arith.constant 0 : i32
    return %arg0, %c0_i32 : i32, i32
  }
}

</mosaic_0001>

<bundles_post_ra>
// kernel: tpu_custom_call.1
= control target key start
LH: loop header
LB: loop body
LE: loop exit
PB: predicated region body
PF: predicated region fallthrough
CT: control target
= control target key end

     0   :  { %6 = vsyncpa [#allocation3], 0  ;;  %s161_s0 = inlined_call_operand.hbm [shape: f32[2,16,128], index: 0, kind: input, shape index: {}]   ;;  %s162_s1 = inlined_call_operand.hbm [shape: f32[2,128], index: 1, kind: output, shape index: {}]  }
   0x1   :  { %7 = vsyncpa [#allocation4], 0  ;;  %s122_s6 = smov [#allocation2]   ;;  %s74_s10 = scalar_lea.hbm %s161_s0, 512 }
   0x2   :  { %s13_s7 = sshll.u32 %s122_s6, 4  ;;  %p75_p0 = scmp.ne.s32.totalorder %s161_s0, %s74_s10  ;;  %s14_s7 = int_to_ptr.vmem [resolvable:$true] %s13_s7 }
   0x3   :  { %p78_p1 = scmp.lt.u32.totalorder %s74_s10, %s161_s0 }
   0x5   :  { %p80_p2 = pnand %p78_p1, %p75_p0 }
   0x7   :  { %83 = shalt.err (!%p80_p2)
}
   0x8   :  { %s84_s15 = scalar_lea.vmem %s14_s7, 512  ;;  %p89_p4 = scmp.lt.s32.totalorder %s14_s7, %s14_s7 }
   0x9   :  { %p85_p3 = scmp.ne.s32.totalorder %s14_s7, %s84_s15  ;;  %p90_p5 = scmp.lt.s32.totalorder %s84_s15, %s84_s15 }
   0xb   :  { %p91_p6 = por %p90_p5, %p89_p4 }
   0xd   :  { %p92_p7 = pnand %p91_p6, %p85_p3 }
   0xf   :  { %95 = shalt.err (!%p92_p7)
}
  0x10   :  { %s123_s16 = smov 128   ;;  %s124_s17 = smov 8  }
  0x11   :  { %19 = dma.hbm_to_vmem [thread:$0]  %s161_s0, 512, %s14_s7, [#allocation3], %s123_s16, %s123_s16, %s124_s17  }
  0x12   :  { %118 = dma.done.wait [#allocation3], 512  }
  0x13   :  { %119 = vsyncadd [#allocation3], 4294966784  ;;  %v125_v0 = vmov -inf   ;;  %v28_v1 = vld [vmem:[#allocation2] sm:$0xff]  ;;  %v29_v2 = vld [vmem:[#allocation2 + $0x8] sm:$0xff]  ;;  %vm49_vm0 = vcmask 1041409  }
  0x14   :  { %27 = vst [vmem:[#allocation5] sm:$0x3] %v125_v0  ;;  %v30_v3 = vld [vmem:[#allocation2 + $0x10] sm:$0xff]  ;;  %v31_v4 = vld [vmem:[#allocation2 + $0x18] sm:$0xff]  ;;  %v33_v5 = vmax.f32 %v28_v1, %v29_v2  ;;  %s126_s0 = smov [#allocation5]  }
  0x15   :  { %v40_v6 = vmax.f32 %v30_v3, %v31_v4  ;;  %s60_s20 = sshll.u32 %s126_s0, 4  ;;  %s61_s20 = int_to_ptr.vmem [resolvable:$true] %s60_s20 }
  0x16   :  { %v34_v7 = vrot.slane %v33_v5, 4  ;;  %s96_s21 = scalar_lea.vmem %s61_s20, 32  ;;  %p101_p9 = scmp.lt.s32.totalorder %s61_s20, %s61_s20 }
  0x17   :  { %v41_v8 = vrot.slane %v40_v6, 4  ;;  %p97_p8 = scmp.ne.s32.totalorder %s61_s20, %s96_s21  ;;  %p102_p10 = scmp.lt.s32.totalorder %s96_s21, %s96_s21 }
  0x18   :  { %v35_v9 = vmax.f32 %v33_v5, %v34_v7 }
  0x19   :  { %v42_v10 = vmax.f32 %v40_v6, %v41_v8  ;;  %p103_p11 = por %p102_p10, %p101_p9 }
  0x1a   :  { %v36_v11 = vrot.slane %v35_v9, 2 }
  0x1b   :  { %v43_v12 = vrot.slane %v42_v10, 2  ;;  %v32_v18 = vld [vmem:[#allocation5] sm:$0x3]  ;;  %p104_p12 = pnand %p103_p11, %p97_p8 }
  0x1c   :  { %v37_v13 = vmax.f32 %v35_v9, %v36_v11 }
  0x1d   :  { %v44_v14 = vmax.f32 %v42_v10, %v43_v12 }
  0x1e   :  { %v38_v15 = vrot.slane %v37_v13, 1 }
  0x1f   :  { %v45_v16 = vrot.slane %v44_v14, 1 }
  0x20   :  { %v39_v17 = vmax.f32 %v37_v13, %v38_v15 }
  0x21   :  { %v46_v19 = vmax.f32 %v44_v14, %v45_v16 }
  0x23   :  { %v50_v20 = vsel %vm49_vm0, %v46_v19, %v39_v17 }
  0x24   :  { %v52_v21 = vmax.f32 %v32_v18, %v50_v20 }
  0x26   :  { %53 = vst [vmem:[#allocation5] sm:$0x3] %v52_v21 }
  0x27   :  { %107 = shalt.err (!%p104_p12)
}
  0x28   :  { %s108_s24 = scalar_lea.hbm %s162_s1, 32 }
  0x29   :  { %p109_p13 = scmp.ne.s32.totalorder %s162_s1, %s108_s24  ;;  %p112_p0 = scmp.lt.u32.totalorder %s108_s24, %s162_s1 }
  0x2b   :  { %p114_p1 = pnand %p112_p0, %p109_p13 }
  0x2d   :  { %117 = shalt.err (!%p114_p1)
}
  0x2e   :  { %63 = dma.vmem_to_hbm [thread:$0]  %s61_s20, 32, %s162_s1, [#allocation4]  }
  0x2f   :  { %120 = dma.done.wait [#allocation4], 32  }
  0x30   :  { %121 = vsyncadd [#allocation4], 4294967264 }
  0x31   :  { %67 = vsyncpa [#allocation3], 1 }
  0x32   :  { %68 = vsyncpa [#allocation4], 1 }

</bundles_post_ra>
